<compile_context>
chip_gen: v7x
topology: tpu7x:2x2x1
jax: 0.10.0
libtpu: 0.0.40
codegen_flags: <defaults>
</compile_context>

<pallas_src>
import functools

import jax
import jax.numpy as jnp
from jax.experimental import pallas as pl
from jax.experimental.pallas import tpu as pltpu

EPS = 1e-6


# ------------------------------ kernel --------------------------------------
def layernorm_kernel(x_ref, a_ref, b_ref, o_ref, *, eps, nfeat):
    x = x_ref[...].astype(jnp.float32)        # (rows, D)
    a = a_ref[...].astype(jnp.float32)        # (1, D) broadcasts over rows
    b = b_ref[...].astype(jnp.float32)        # (1, D)

    mean = jnp.mean(x, axis=-1, keepdims=True)
    xc = x - mean
    # unbiased variance (divide by n-1), exactly like torch.std(dim=-1)
    var = jnp.sum(xc * xc, axis=-1, keepdims=True) * (1.0 / (nfeat - 1))
    std = jnp.sqrt(var)
    out = a * (xc / (std + eps)) + b
    o_ref[...] = out.astype(o_ref.dtype)


# ------------------------------ wrapper --------------------------------------
def layernorm(x, a2, b2, eps=EPS, block_rows=None):
    """LayerNorm over the last dim of x; a2/b2 have shape (features,)."""
    orig_shape = x.shape
    d = orig_shape[-1]
    xf = x.reshape(-1, d)                     # lane-dense (N, D); rows independent
    n = xf.shape[0]

    if block_rows is None:
        if n <= 1024:
            # Whole problem in one grid step: no per-step overhead, params
            # staged once.
            block_rows = n
        else:
            # Tile rows for large inputs; keep the sublane dim a multiple of 8.
            block_rows = 1024

    grid = (pl.cdiv(n, block_rows),)

    out = pl.pallas_call(
        functools.partial(layernorm_kernel, eps=eps, nfeat=d),
        out_shape=jax.ShapeDtypeStruct((n, d), x.dtype),
        grid=grid,
        in_specs=[
            pl.BlockSpec((block_rows, d), lambda i: (i, 0)),   # x row tile
            pl.BlockSpec((1, d), lambda i: (0, 0)),            # a_2 (shared)
            pl.BlockSpec((1, d), lambda i: (0, 0)),            # b_2 (shared)
        ],
        out_specs=pl.BlockSpec((block_rows, d), lambda i: (i, 0)),
        compiler_params=pltpu.CompilerParams(
            dimension_semantics=("parallel",)),                # row tiles independent
    )(xf, a2.reshape(1, d), b2.reshape(1, d))

    return out.reshape(orig_shape)


# --------------------------- pure-JAX reference -------------------------------
def layernorm_ref(x, a2, b2, eps=EPS):
    mean = jnp.mean(x, axis=-1, keepdims=True)
    xc = x - mean
    var = jnp.sum(xc * xc, axis=-1, keepdims=True) / (x.shape[-1] - 1)
    std = jnp.sqrt(var)
    return a2 * xc / (std + eps) + b2


# --------------------------------- main ---------------------------------------
if __name__ == "__main__":
    key = jax.random.PRNGKey(0)
    k0, k1, k2, k3, k4, k5 = jax.random.split(key, 6)

    # Primary (lane-dense) case: features = 128 == one full vreg lane width.
    B, T, D = 2, 8, 128
    x = jax.random.normal(k0, (B, T, D), dtype=jnp.float32)
    a2 = 1.0 + 0.05 * jax.random.normal(k1, (D,), dtype=jnp.float32)
    b2 = 0.05 * jax.random.normal(k2, (D,), dtype=jnp.float32)

    out = layernorm(x, a2, b2)
    out = jax.block_until_ready(out)
    ref = layernorm_ref(x, a2, b2)
    assert out.shape == (B, T, D)
    assert jnp.allclose(out, ref, atol=1e-5, rtol=1e-5), "mismatch vs JAX reference (D=128)"

    # Generality check: small, non-lane-dense feature size (D=32) still correct.
    D2 = 32
    x2 = jax.random.normal(k3, (B, T, D2), dtype=jnp.float32)
    a22 = 1.0 + 0.05 * jax.random.normal(k4, (D2,), dtype=jnp.float32)
    b22 = 0.05 * jax.random.normal(k5, (D2,), dtype=jnp.float32)

    out2 = layernorm(x2, a22, b22)
    out2 = jax.block_until_ready(out2)
    ref2 = layernorm_ref(x2, a22, b22)
    assert jnp.allclose(out2, ref2, atol=1e-5, rtol=1e-5), "mismatch vs JAX reference (D=32)"

    print("KERNEL_OK")
</pallas_src>

<mosaic_0001>
module attributes {stable_mosaic.version = 11 : i64} {
  func.func @layernorm_kernel(%arg0: i32, %arg1: memref<16x128xf32, #tpu.memory_space<vmem>>, %arg2: memref<1x128xf32, #tpu.memory_space<vmem>>, %arg3: memref<1x128xf32, #tpu.memory_space<vmem>>, %arg4: memref<16x128xf32, #tpu.memory_space<vmem>>) attributes {dimension_semantics = [#tpu.dimension_semantics<parallel>], iteration_bounds = array<i64: 1>, scalar_prefetch = 0 : i64, scratch_operands = 0 : i64, tpu.core_type = #tpu.core_type<tc>, window_params = [{transform_indices = @transform_0, window_bounds = array<i64: 16, 128>}, {pipeline_mode = #tpu.pipeline_mode<synchronous>, transform_indices = @transform_1, window_bounds = array<i64: 1, 128>}, {pipeline_mode = #tpu.pipeline_mode<synchronous>, transform_indices = @transform_2, window_bounds = array<i64: 1, 128>}, {transform_indices = @transform_3, window_bounds = array<i64: 16, 128>}]} {
    %c0 = arith.constant 0 : index
    %c0_0 = arith.constant 0 : index
    %0 = vector.load %arg1[%c0, %c0_0] : memref<16x128xf32, #tpu.memory_space<vmem>>, vector<16x128xf32>
    %c0_1 = arith.constant 0 : index
    %c0_2 = arith.constant 0 : index
    %1 = vector.load %arg2[%c0_1, %c0_2] : memref<1x128xf32, #tpu.memory_space<vmem>>, vector<1x128xf32>
    %c0_3 = arith.constant 0 : index
    %c0_4 = arith.constant 0 : index
    %2 = vector.load %arg3[%c0_3, %c0_4] : memref<1x128xf32, #tpu.memory_space<vmem>>, vector<1x128xf32>
    %cst = arith.constant dense<0.000000e+00> : vector<16xf32>
    %3 = vector.multi_reduction <add>, %0, %cst [1] : vector<16x128xf32> to vector<16xf32>
    %4 = vector.shape_cast %3 : vector<16xf32> to vector<16x1xf32>
    %cst_5 = arith.constant 1.280000e+02 : f32
    %5 = vector.broadcast %cst_5 : f32 to vector<16x1xf32>
    %6 = arith.divf %4, %5 : vector<16x1xf32>
    %7 = vector.broadcast %6 : vector<16x1xf32> to vector<16x128xf32>
    %8 = arith.subf %0, %7 : vector<16x128xf32>
    %9 = arith.mulf %8, %8 : vector<16x128xf32>
    %cst_6 = arith.constant dense<0.000000e+00> : vector<16xf32>
    %10 = vector.multi_reduction <add>, %9, %cst_6 [1] : vector<16x128xf32> to vector<16xf32>
    %11 = vector.shape_cast %10 : vector<16xf32> to vector<16x1xf32>
    %cst_7 = arith.constant 0.00787401571 : f32
    %12 = vector.broadcast %cst_7 : f32 to vector<16x1xf32>
    %13 = arith.mulf %11, %12 : vector<16x1xf32>
    %14 = math.sqrt %13 : vector<16x1xf32>
    %cst_8 = arith.constant 9.99999997E-7 : f32
    %15 = vector.broadcast %cst_8 : f32 to vector<16x1xf32>
    %16 = arith.addf %14, %15 : vector<16x1xf32>
    %17 = vector.broadcast %16 : vector<16x1xf32> to vector<16x128xf32>
    %18 = arith.divf %8, %17 : vector<16x128xf32>
    %19 = vector.broadcast %1 : vector<1x128xf32> to vector<16x128xf32>
    %20 = arith.mulf %19, %18 : vector<16x128xf32>
    %21 = vector.broadcast %2 : vector<1x128xf32> to vector<16x128xf32>
    %22 = arith.addf %20, %21 : vector<16x128xf32>
    %c0_9 = arith.constant 0 : index
    %c0_10 = arith.constant 0 : index
    %23 = vector.load %arg4[%c0_9, %c0_10] : memref<16x128xf32, #tpu.memory_space<vmem>>, vector<16x128xf32>
    tpu.vector_store %arg4[%c0_9, %c0_10], %22 {strides = array<i32>} : memref<16x128xf32, #tpu.memory_space<vmem>>, vector<16x128xf32>,
    return
  }
  func.func @transform_0(%arg0: i32) -> (i32, i32) {
    %c0_i32 = arith.constant 0 : i32
    %c0_i32_0 = arith.constant 0 : i32
    return %arg0, %c0_i32 : i32, i32
  }
  func.func @transform_1(%arg0: i32) -> (i32, i32) {
    %c0_i32 = arith.constant 0 : i32
    %c0_i32_0 = arith.constant 0 : i32
    %c0_i32_1 = arith.constant 0 : i32
    return %c0_i32, %c0_i32_0 : i32, i32
  }
  func.func @transform_2(%arg0: i32) -> (i32, i32) {
    %c0_i32 = arith.constant 0 : i32
    %c0_i32_0 = arith.constant 0 : i32
    %c0_i32_1 = arith.constant 0 : i32
    return %c0_i32, %c0_i32_0 : i32, i32
  }
  func.func @transform_3(%arg0: i32) -> (i32, i32) {
    %c0_i32 = arith.constant 0 : i32
    %c0_i32_0 = arith.constant 0 : i32
    return %arg0, %c0_i32 : i32, i32
  }
}

</mosaic_0001>

<bundles_post_ra>
// kernel: tpu_custom_call.1
= control target key start
LH: loop header
LB: loop body
LE: loop exit
PB: predicated region body
PF: predicated region fallthrough
CT: control target
= control target key end

     0   :  { %8 = vsyncpa [#allocation3], 0  ;;  %s227_s0 = inlined_call_operand.hbm [shape: f32[16,128], index: 0, kind: input, shape index: {}]   ;;  %s228_s1 = inlined_call_operand.vmem [shape: f32[1,128], index: 1, kind: input, shape index: {}]   ;;  %s229_s2 = inlined_call_operand.vmem [shape: f32[1,128], index: 2, kind: input, shape index: {}]   ;;  %s230_s3 = inlined_call_operand.hbm [shape: f32[16,128], index: 3, kind: output, shape index: {}]  }
   0x1   :  { %9 = vsyncpa [#allocation4], 0  ;;  %s167_s12 = smov [#allocation2]   ;;  %s119_s16 = scalar_lea.hbm %s227_s0, 256 }
   0x2   :  { %s15_s13 = sshll.u32 %s167_s12, 4  ;;  %p120_p0 = scmp.ne.s32.totalorder %s227_s0, %s119_s16  ;;  %s16_s13 = int_to_ptr.vmem [resolvable:$true] %s15_s13 }
   0x3   :  { %p123_p1 = scmp.lt.u32.totalorder %s119_s16, %s227_s0 }
   0x5   :  { %p125_p2 = pnand %p123_p1, %p120_p0 }
   0x7   :  { %128 = shalt.err (!%p125_p2)
}
   0x8   :  { %s129_s21 = scalar_lea.vmem %s16_s13, 256  ;;  %p134_p4 = scmp.lt.s32.totalorder %s16_s13, %s16_s13 }
   0x9   :  { %p130_p3 = scmp.ne.s32.totalorder %s16_s13, %s129_s21  ;;  %p135_p5 = scmp.lt.s32.totalorder %s129_s21, %s129_s21 }
   0xb   :  { %p136_p6 = por %p135_p5, %p134_p4 }
   0xd   :  { %p137_p7 = pnand %p136_p6, %p130_p3 }
   0xf   :  { %140 = shalt.err (!%p137_p7)
}
  0x10   :  { %s168_s22 = smov 128   ;;  %s169_s23 = smov 8  }
  0x11   :  { %21 = dma.hbm_to_vmem [thread:$0]  %s227_s0, 256, %s16_s13, [#allocation3], %s168_s22, %s168_s22, %s169_s23  }
  0x12   :  { %163 = dma.done.wait [#allocation3], 256  }
  0x13   :  { %164 = vsyncadd [#allocation3], 4294967040  ;;  %v29_v0 = vld [vmem:[#allocation2] sm:$0xff]  ;;  %v30_v1 = vld [vmem:[#allocation2 + $0x8] sm:$0xff]  ;;  %s170_s29 = smov [#allocation5]  }
  0x14   :  { %33 = vadd.xlane.f32.xlu0 %v29_v0  ;;  %v105_v27 = vld [vmem:[%s228_s1] ss:$0 sm:$0xff]  ;;  %s93_s30 = sshll.u32 %s170_s29, 4  ;;  %s94_s30 = int_to_ptr.vmem [resolvable:$true] %s93_s30 }
  0x15   :  { %v106_v29 = vld [vmem:[%s229_s2] ss:$0 sm:$0xff]  ;;  %s141_s4 = scalar_lea.vmem %s94_s30, 256  ;;  %p146_p9 = scmp.lt.s32.totalorder %s94_s30, %s94_s30 }
  0x16   :  { %p142_p8 = scmp.ne.s32.totalorder %s94_s30, %s141_s4  ;;  %p147_p10 = scmp.lt.s32.totalorder %s141_s4, %s141_s4 }
  0x18   :  { %35 = vadd.xlane.f32.xlu0 %v30_v1  ;;  %p148_p11 = por %p147_p10, %p146_p9 }
  0x1a   :  { %p149_p12 = pnand %p148_p11, %p142_p8 }
  0xa1   :  { %v34_v2 = vpop.xlane.xlu0 %33 }
  0xa2   :  { %v38_v3 = vmul.f32 0.0078125, %v34_v2 }
  0xa4   :  { %v40_v4 = vsub.f32 %v29_v0, %v38_v3 }
  0xa5   :  { %v36_v5 = vpop.xlane.xlu0 %35 }
  0xa6   :  { %v39_v6 = vmul.f32 0.0078125, %v36_v5  ;;  %v42_v7 = vmul.f32 %v40_v4, %v40_v4 }
  0xa8   :  { %v41_v8 = vsub.f32 %v30_v1, %v39_v6  ;;  %44 = vadd.xlane.f32.xlu1 %v42_v7 }
  0xaa   :  { %v43_v9 = vmul.f32 %v41_v8, %v41_v8 }
  0xac   :  { %46 = vadd.xlane.f32.xlu1 %v43_v9 }
 0x135   :  { %v45_v10 = vpop.xlane.xlu1 %44 }
 0x136   :  { %v48_v11 = vmul.f32 0.007874016, %v45_v10 }
 0x138   :  { %111 = vrsqrt.f32 %v48_v11  ;;  %vm52_vm0 = vcmp.eq.f32.partialorder %v48_v11, inf  ;;  %v55_v16 = vand.u32 2147483648, %v48_v11  ;;  %vm54_vm1 = vcmp.eq.f32.partialorder %v48_v11, 0.0 }
 0x139   :  { %v47_v12 = vpop.xlane.xlu1 %46 }
 0x13a   :  { %v49_v13 = vmul.f32 0.007874016, %v47_v12 }
 0x13c   :  { %113 = vrsqrt.f32 %v49_v13  ;;  %vm59_vm2 = vcmp.eq.f32.partialorder %v49_v13, inf  ;;  %v62_v22 = vand.u32 2147483648, %v49_v13  ;;  %vm61_vm3 = vcmp.eq.f32.partialorder %v49_v13, 0.0 }
 0x142   :  { %v112_v14 = vpop.eup %111 }
 0x143   :  { %v51_v15 = vmul.f32 %v112_v14, %v48_v11 }
 0x145   :  { %v53_v17 = vsel %vm52_vm0, %v48_v11, %v51_v15 }
 0x146   :  { %v114_v18 = vpop.eup %113  ;;  %v56_v19 = vsel %vm54_vm1, %v55_v16, %v53_v17 }
 0x147   :  { %v58_v20 = vmul.f32 %v114_v18, %v49_v13  ;;  %v64_v21 = vadd.f32 1e-06, %v56_v19 }
 0x149   :  { %v60_v23 = vsel %vm59_vm2, %v49_v13, %v58_v20  ;;  %115 = vrcp.f32 %v64_v21 }
 0x14a   :  { %v63_v24 = vsel %vm61_vm3, %v62_v22, %v60_v23 }
 0x14b   :  { %v65_v25 = vadd.f32 1e-06, %v63_v24 }
 0x14d   :  { %117 = vrcp.f32 %v65_v25 }
 0x153   :  { %v116_v26 = vpop.eup %115 }
 0x154   :  { %v67_v28 = vmul.f32 %v116_v26, %v40_v4 }
 0x156   :  { %v76_v30 = vmul.f32 %v105_v27, %v67_v28 }
 0x157   :  { %v118_v31 = vpop.eup %117 }
 0x158   :  { %v69_v32 = vmul.f32 %v118_v31, %v41_v8  ;;  %v84_v33 = vadd.f32 %v106_v29, %v76_v30 }
 0x15a   :  { %v77_v34 = vmul.f32 %v105_v27, %v69_v32  ;;  %86 = vst [vmem:[#allocation5] sm:$0xff] %v84_v33 }
 0x15c   :  { %v85_v35 = vadd.f32 %v106_v29, %v77_v34 }
 0x15e   :  { %87 = vst [vmem:[#allocation5 + $0x8] sm:$0xff] %v85_v35 }
 0x15f   :  { %152 = shalt.err (!%p149_p12)
}
 0x160   :  { %s153_s5 = scalar_lea.hbm %s230_s3, 256 }
 0x161   :  { %p154_p13 = scmp.ne.s32.totalorder %s230_s3, %s153_s5  ;;  %p157_p0 = scmp.lt.u32.totalorder %s153_s5, %s230_s3 }
 0x163   :  { %p159_p1 = pnand %p157_p0, %p154_p13 }
 0x165   :  { %162 = shalt.err (!%p159_p1)
}
 0x166   :  { %99 = dma.vmem_to_hbm [thread:$0]  %s94_s30, 256, %s230_s3, [#allocation4], %s168_s22, %s168_s22, %s169_s23  }
 0x167   :  { %165 = dma.done.wait [#allocation4], 256  }
 0x168   :  { %166 = vsyncadd [#allocation4], 4294967040 }
 0x169   :  { %103 = vsyncpa [#allocation3], 1 }
 0x16a   :  { %104 = vsyncpa [#allocation4], 1 }

</bundles_post_ra>
